<compile_context>
chip_gen: v7x
topology: tpu7x:2x2x1
jax: 0.10.0
libtpu: 0.0.40
codegen_flags: <defaults>
</compile_context>

<pallas_src>
import functools

import jax
import jax.numpy as jnp
from jax import lax
from jax.experimental import pallas as pl
from jax.experimental.pallas import tpu as pltpu


def _ln_kernel(x_ref, g_ref, b_ref, o_ref, *, eps):
    # x_ref: [NB, C, TL]; normalize across channels (axis 1) per lane column.
    x = x_ref[...].astype(jnp.float32)
    mean = jnp.mean(x, axis=1, keepdims=True)              # [NB, 1, TL]
    xc = x - mean
    var = jnp.mean(xc * xc, axis=1, keepdims=True)         # biased (unbiased=False)
    inv = lax.rsqrt(var + jnp.float32(eps))                 # EUP rsqrt, no divide
    gain = g_ref[...].astype(jnp.float32)[None]             # [1, C, 1]
    bias = b_ref[...].astype(jnp.float32)[None]             # [1, C, 1]
    o_ref[...] = (xc * inv * gain + bias).astype(o_ref.dtype)


def _ln_mix_kernel(x_ref, g_ref, b_ref, w_ref, o_ref, *, eps):
    # LayerNorm + fused channel-mixing matmul (1x1 conv) epilogue on the MXU.
    x = x_ref[...].astype(jnp.float32)                      # [NB, C, TL]
    mean = jnp.mean(x, axis=1, keepdims=True)
    xc = x - mean
    var = jnp.mean(xc * xc, axis=1, keepdims=True)
    inv = lax.rsqrt(var + jnp.float32(eps))
    gain = g_ref[...].astype(jnp.float32)[None]
    bias = b_ref[...].astype(jnp.float32)[None]
    y = xc * inv * gain + bias                               # [NB, C, TL] f32
    w = w_ref[...].astype(jnp.float32)                       # [Cout, C]
    for n in range(y.shape[0]):                              # NB is static, small
        o_ref[n] = jnp.dot(w, y[n],
                           preferred_element_type=jnp.float32).astype(o_ref.dtype)


def _choose_tiles(B, C, Cout, Lp, itemsize, vmem_cap_bytes=20 * (1 << 20)):
    """Pick (NB, tl, vmem_limit): big lane-dense blocks, capped for VMEM."""
    n128 = Lp // 128
    divs = [128 * k for k in range(1, min(n128, 16) + 1) if n128 % k == 0]

    def blk_bytes(nb, t):
        # double-buffered input + output blocks at I/O dtype
        return 2 * nb * (C + Cout) * t * itemsize

    tl = divs[0]
    for t in sorted(divs, reverse=True):                     # biggest tile that fits
        if blk_bytes(1, t) <= vmem_cap_bytes:
            tl = t
            break

    steps_l = Lp // tl
    total = B * steps_l
    min_steps = min(4, total)                                 # keep megacore busy
    NB = 1
    for nb in sorted((d for d in range(1, B + 1) if B % d == 0), reverse=True):
        if blk_bytes(nb, tl) <= vmem_cap_bytes and (B // nb) * steps_l >= min_steps:
            NB = nb
            break

    needed = blk_bytes(NB, tl) + 4 * (2 * C + Cout * C) + (1 << 20)
    vmem_limit = int(min(max(needed + (8 << 20), 16 << 20), 48 << 20))
    return NB, tl, vmem_limit


def layer_norm(x, g, b, *, eps=1e-5, mix_weight=None):
    """Channel-wise LayerNorm of x:[B,C,L] with g,b:(1,C,1) (PyTorch layout).

    If mix_weight ([Cout, C]) is given, a channel-mixing matmul is fused as a
    kernel epilogue and the result has Cout channels.
    """
    B, C, L = x.shape
    Lp = ((L + 127) // 128) * 128                             # keep lanes dense
    xp = x if Lp == L else jnp.pad(x, ((0, 0), (0, 0), (0, Lp - L)))
    g2 = jnp.asarray(g, jnp.float32).reshape(C, 1)            # keep params in f32
    b2 = jnp.asarray(b, jnp.float32).reshape(C, 1)

    fused = mix_weight is not None
    Cout = int(mix_weight.shape[0]) if fused else C
    NB, tl, vmem_limit = _choose_tiles(B, C, Cout, Lp,
                                       jnp.dtype(x.dtype).itemsize)
    grid = (B // NB, Lp // tl)

    x_spec = pl.BlockSpec((NB, C, tl), lambda bi, li: (bi, 0, li))
    p_spec = pl.BlockSpec((C, 1), lambda bi, li: (0, 0))
    o_spec = pl.BlockSpec((NB, Cout, tl), lambda bi, li: (bi, 0, li))

    in_specs = [x_spec, p_spec, p_spec]
    args = [xp, g2, b2]
    if fused:
        in_specs.append(pl.BlockSpec((Cout, C), lambda bi, li: (0, 0)))
        args.append(jnp.asarray(mix_weight, jnp.float32))
        kernel = functools.partial(_ln_mix_kernel, eps=eps)
    else:
        kernel = functools.partial(_ln_kernel, eps=eps)

    out = pl.pallas_call(
        kernel,
        out_shape=jax.ShapeDtypeStruct((B, Cout, Lp), x.dtype),
        grid_spec=pltpu.PrefetchScalarGridSpec(
            num_scalar_prefetch=0,
            grid=grid,
            in_specs=in_specs,
            out_specs=o_spec,
        ),
        compiler_params=pltpu.CompilerParams(
            dimension_semantics=("parallel", "parallel"),
            vmem_limit_bytes=vmem_limit),
    )(*args)
    return out if Lp == L else out[:, :, :L]


def pre_norm(x, g, b, fn=None, *, eps=1e-5, mix_weight=None):
    """PreNorm.forward: fn(LayerNorm(x)).

    If `fn`'s first op is a channel-mixing matmul (1x1 conv / qkv projection),
    pass its weight as `mix_weight` ([Cout, C]); it is fused into the kernel
    epilogue and `fn` should then be the remainder of the module (or None).
    """
    # TODO(synk): arbitrary user-supplied `fn` submodules are applied outside
    # the kernel as plain JAX callables; only a leading channel-mixing matmul
    # is fused into the Pallas kernel.
    y = layer_norm(x, g, b, eps=eps, mix_weight=mix_weight)
    return fn(y) if fn is not None else y


if __name__ == "__main__":
    eps = 1e-5
    key = jax.random.PRNGKey(0)
    kx1, kx2, kw = jax.random.split(key, 3)

    B, C = 2, 32
    # Deterministic non-trivial LayerNorm parameters (PyTorch shape (1, C, 1)).
    g = (1.0 + 0.1 * jnp.sin(jnp.arange(C, dtype=jnp.float32))).reshape(1, C, 1)
    b = (0.05 * jnp.cos(jnp.arange(C, dtype=jnp.float32))).reshape(1, C, 1)

    # Stand-in for the wrapped submodule: a 1x1 channel-mixing conv.
    W = 0.1 * jax.random.normal(kw, (C, C), dtype=jnp.float32)
    fn = lambda y: jnp.einsum('cd,bdl->bcl', W, y)

    def ln_ref(x):
        xf = x.astype(jnp.float32)
        mean = jnp.mean(xf, axis=1, keepdims=True)
        var = jnp.mean((xf - mean) ** 2, axis=1, keepdims=True)
        return (xf - mean) / jnp.sqrt(var + eps) * g + b

    # Case 1: L a multiple of 128; fn's 1x1 conv fused into the kernel epilogue.
    L1 = 256
    x1 = jax.random.normal(kx1, (B, C, L1), dtype=jnp.float32)
    out1 = pre_norm(x1, g, b, fn=None, mix_weight=W, eps=eps)
    jax.block_until_ready(out1)
    ref1 = fn(ln_ref(x1))
    assert out1.shape == ref1.shape, (out1.shape, ref1.shape)
    assert jnp.allclose(out1, ref1, rtol=1e-5, atol=1e-4), (
        float(jnp.max(jnp.abs(out1 - ref1))))

    # Case 2: L not a multiple of 128 (exercises lane padding); fn applied outside.
    L2 = 200
    x2 = jax.random.normal(kx2, (B, C, L2), dtype=jnp.float32)
    out2 = pre_norm(x2, g, b, fn=fn, eps=eps)
    jax.block_until_ready(out2)
    ref2 = fn(ln_ref(x2))
    assert out2.shape == ref2.shape, (out2.shape, ref2.shape)
    assert jnp.allclose(out2, ref2, rtol=1e-5, atol=1e-4), (
        float(jnp.max(jnp.abs(out2 - ref2))))

    print("KERNEL_OK")
</pallas_src>

<mosaic_0001>
module attributes {stable_mosaic.version = 11 : i64} {
  func.func @_ln_mix_kernel(%arg0: i32, %arg1: i32, %arg2: memref<1x32x256xf32, #tpu.memory_space<vmem>>, %arg3: memref<32x1xf32, #tpu.memory_space<vmem>>, %arg4: memref<32x1xf32, #tpu.memory_space<vmem>>, %arg5: memref<32x32xf32, #tpu.memory_space<vmem>>, %arg6: memref<1x32x256xf32, #tpu.memory_space<vmem>>) attributes {dimension_semantics = [#tpu.dimension_semantics<parallel>, #tpu.dimension_semantics<parallel>], iteration_bounds = array<i64: 2, 1>, scalar_prefetch = 0 : i64, scratch_operands = 0 : i64, tpu.core_type = #tpu.core_type<tc>, window_params = [{transform_indices = @transform_0, window_bounds = array<i64: 1, 32, 256>}, {pipeline_mode = #tpu.pipeline_mode<synchronous>, transform_indices = @transform_1, window_bounds = array<i64: 32, 1>}, {pipeline_mode = #tpu.pipeline_mode<synchronous>, transform_indices = @transform_2, window_bounds = array<i64: 32, 1>}, {pipeline_mode = #tpu.pipeline_mode<synchronous>, transform_indices = @transform_3, window_bounds = array<i64: 32, 32>}, {transform_indices = @transform_4, window_bounds = array<i64: 1, 32, 256>}]} {
    %c0 = arith.constant 0 : index
    %c0_0 = arith.constant 0 : index
    %c0_1 = arith.constant 0 : index
    %0 = vector.load %arg2[%c0, %c0_0, %c0_1] : memref<1x32x256xf32, #tpu.memory_space<vmem>>, vector<1x32x256xf32>
    %cst = arith.constant dense<0.000000e+00> : vector<1x256xf32>
    %1 = vector.multi_reduction <add>, %0, %cst [1] : vector<1x32x256xf32> to vector<1x256xf32>
    %2 = vector.shape_cast %1 : vector<1x256xf32> to vector<1x1x256xf32>
    %cst_2 = arith.constant 3.200000e+01 : f32
    %3 = vector.broadcast %cst_2 : f32 to vector<1x1x256xf32>
    %4 = arith.divf %2, %3 : vector<1x1x256xf32>
    %5 = vector.broadcast %4 : vector<1x1x256xf32> to vector<1x32x256xf32>
    %6 = arith.subf %0, %5 : vector<1x32x256xf32>
    %7 = arith.mulf %6, %6 : vector<1x32x256xf32>
    %cst_3 = arith.constant dense<0.000000e+00> : vector<1x256xf32>
    %8 = vector.multi_reduction <add>, %7, %cst_3 [1] : vector<1x32x256xf32> to vector<1x256xf32>
    %9 = vector.shape_cast %8 : vector<1x256xf32> to vector<1x1x256xf32>
    %cst_4 = arith.constant 3.200000e+01 : f32
    %10 = vector.broadcast %cst_4 : f32 to vector<1x1x256xf32>
    %11 = arith.divf %9, %10 : vector<1x1x256xf32>
    %cst_5 = arith.constant 9.99999974E-6 : f32
    %12 = vector.broadcast %cst_5 : f32 to vector<1x1x256xf32>
    %13 = arith.addf %11, %12 : vector<1x1x256xf32>
    %14 = math.rsqrt %13 : vector<1x1x256xf32>
    %c0_6 = arith.constant 0 : index
    %c0_7 = arith.constant 0 : index
    %15 = vector.load %arg3[%c0_6, %c0_7] : memref<32x1xf32, #tpu.memory_space<vmem>>, vector<32x1xf32>
    %16 = vector.shape_cast %15 : vector<32x1xf32> to vector<1x32x1xf32>
    %c0_8 = arith.constant 0 : index
    %c0_9 = arith.constant 0 : index
    %17 = vector.load %arg4[%c0_8, %c0_9] : memref<32x1xf32, #tpu.memory_space<vmem>>, vector<32x1xf32>
    %18 = vector.shape_cast %17 : vector<32x1xf32> to vector<1x32x1xf32>
    %19 = vector.broadcast %14 : vector<1x1x256xf32> to vector<1x32x256xf32>
    %20 = arith.mulf %6, %19 : vector<1x32x256xf32>
    %21 = vector.broadcast %16 : vector<1x32x1xf32> to vector<1x32x256xf32>
    %22 = arith.mulf %20, %21 : vector<1x32x256xf32>
    %23 = vector.broadcast %18 : vector<1x32x1xf32> to vector<1x32x256xf32>
    %24 = arith.addf %22, %23 : vector<1x32x256xf32>
    %c0_10 = arith.constant 0 : index
    %c0_11 = arith.constant 0 : index
    %25 = vector.load %arg5[%c0_10, %c0_11] : memref<32x32xf32, #tpu.memory_space<vmem>>, vector<32x32xf32>
    %26 = vector.shape_cast %24 : vector<1x32x256xf32> to vector<32x256xf32>
    %cst_12 = arith.constant dense<0.000000e+00> : vector<32x256xf32>
    %27 = tpu.matmul %25, %26, %cst_12 {dimension_numbers = #tpu.dot_dimension_numbers<[1], [0], [0], [1], [0, 0, 1, 1], [], []>} : vector<32x32xf32>, vector<32x256xf32>, vector<32x256xf32> -> vector<32x256xf32>
    %c0_13 = arith.constant 0 : index
    %c0_14 = arith.constant 0 : index
    %c0_15 = arith.constant 0 : index
    %28 = vector.load %arg6[%c0_13, %c0_14, %c0_15] : memref<1x32x256xf32, #tpu.memory_space<vmem>>, vector<1x32x256xf32>
    %29 = vector.shape_cast %28 : vector<1x32x256xf32> to vector<32x256xf32>
    %30 = vector.shape_cast %27 : vector<32x256xf32> to vector<1x32x256xf32>
    tpu.vector_store %arg6[%c0_13, %c0_14, %c0_15], %30 {strides = array<i32>} : memref<1x32x256xf32, #tpu.memory_space<vmem>>, vector<1x32x256xf32>,
    return
  }
  func.func @transform_0(%arg0: i32, %arg1: i32) -> (i32, i32, i32) {
    %c0_i32 = arith.constant 0 : i32
    %c0_i32_0 = arith.constant 0 : i32
    return %arg0, %c0_i32, %arg1 : i32, i32, i32
  }
  func.func @transform_1(%arg0: i32, %arg1: i32) -> (i32, i32) {
    %c0_i32 = arith.constant 0 : i32
    %c0_i32_0 = arith.constant 0 : i32
    %c0_i32_1 = arith.constant 0 : i32
    return %c0_i32, %c0_i32_0 : i32, i32
  }
  func.func @transform_2(%arg0: i32, %arg1: i32) -> (i32, i32) {
    %c0_i32 = arith.constant 0 : i32
    %c0_i32_0 = arith.constant 0 : i32
    %c0_i32_1 = arith.constant 0 : i32
    return %c0_i32, %c0_i32_0 : i32, i32
  }
  func.func @transform_3(%arg0: i32, %arg1: i32) -> (i32, i32) {
    %c0_i32 = arith.constant 0 : i32
    %c0_i32_0 = arith.constant 0 : i32
    %c0_i32_1 = arith.constant 0 : i32
    return %c0_i32, %c0_i32_0 : i32, i32
  }
  func.func @transform_4(%arg0: i32, %arg1: i32) -> (i32, i32, i32) {
    %c0_i32 = arith.constant 0 : i32
    %c0_i32_0 = arith.constant 0 : i32
    return %arg0, %c0_i32, %arg1 : i32, i32, i32
  }
}

</mosaic_0001>

<bundles_post_ra>
// kernel: tpu_custom_call.1
= control target key start
LH: loop header
LB: loop body
LE: loop exit
PB: predicated region body
PF: predicated region fallthrough
CT: control target
= control target key end

     0   :  { %9 = vsyncpa [#allocation3], 0  ;;  %s1077_s0 = inlined_call_operand.hbm [shape: f32[2,32,256], index: 0, kind: input, shape index: {}]   ;;  %s1078_s1 = inlined_call_operand.vmem [shape: f32[32,1], index: 1, kind: input, shape index: {}]   ;;  %s1079_s2 = inlined_call_operand.vmem [shape: f32[32,1], index: 2, kind: input, shape index: {}]   ;;  %s1080_s3 = inlined_call_operand.vmem [shape: f32[32,32], index: 3, kind: input, shape index: {}]   ;;  %s1081_s4 = inlined_call_operand.hbm [shape: f32[2,32,256], index: 4, kind: output, shape index: {}]  }
   0x1   :  { %11 = vsyncpa [#allocation3 + $0x1], 0 }
   0x2   :  { %12 = vsyncpa [#allocation4], 0 }
   0x3   :  { %14 = vsyncpa [#allocation4 + $0x1], 0  ;;  %s848_s15 = smov 0   ;;  %s850_s16 = smov 0  }
   0x4   :  { %s852_s17 = smov 0   ;;  %s854_s18 = smov 0  }
   0x5   :  { %s856_s19 = smov 0   ;;  %s858_s20 = smov 0  }
   0x6 LB: > { %s594_s21 = sadd.s32 4294967295, %s813_s20   ;;  %s595_s22 = sadd.s32 4294967294, %s813_s20   ;;  %s813_s20 = sphi %s858_s20, %s20_s20   ;;  %s809_s19 = sphi %s856_s19, %s1096_s19   ;;  %s805_s18 = sphi %s854_s18, %s1095_s18   ;;  %s801_s17 = sphi %s852_s17, %s1094_s17   ;;  %s797_s16 = sphi %s850_s16, %s1093_s16   ;;  %s793_s15 = sphi %s848_s15, %s1092_s15  }
   0x7   : > { %s32_s23 = sadd.s32 1, %s809_s19  ;;  %s41_s24 = sadd.s32 1, %s801_s17 }
   0x8   : > { %p34_p0 = scmp.ge.s32.totalorder %s32_s23, 2  ;;  %p48_p1 = scmp.ne.s32.totalorder %s801_s17, %s797_s16 }
   0x9   : > { %p49_p2 = scmp.eq.s32.totalorder %s813_s20, 0  ;;  %p54_p3 = scmp.ne.s32.totalorder %s797_s16, %s793_s15 }
   0xa   : > { %s1098_s23 = smov (%p34_p0, %s32_s23), 0  ;;  %p55_p5 = scmp.eq.s32.totalorder %s594_s21, 0 }
   0xb   : > { %p889_p4 = por %p49_p2, %p48_p1  ;;  %s36_s26 = ssub.s32 %s809_s19, %s1098_s23 }
   0xc   : > { %p143_p6 = scmp.eq.s32.totalorder %s594_s21, 1  ;;  %p39_p7 = scmp.eq.s32.totalorder %s36_s26, 0 }
   0xd   : > { %p895_p8 = por %p55_p5, %p54_p3  ;;  %p149_p10 = scmp.eq.s32.totalorder %s595_s22, 1 }
   0xe   : > { %p899_p9 = por %p143_p6, %p48_p1  ;;  %p639_p13 = scmp.lt.s32.totalorder %s813_s20, 2 }
   0xf   : > { %s904_s29 = scalar_select %p39_p7, %s801_s17, %s41_s24  }
  0x10   : > { %s1085_s28 = scalar_select %p899_p9, 1, 0 }
  0x11   : > { %p906_p11 = por %p149_p10, %p54_p3  ;;  %s178_s5 = sand.u32 1, %s801_s17  }
  0x12   : > { %s598_s6 = sshll.u32 %s178_s5, 6  ;;  %s613_s7 = sshll.u32 %s809_s19, 10 }
  0x13   : > { %s1086_s30 = scalar_select %p906_p11, 1, 0 }
  0x14   : > { %s917_s10 = scalar_lea.hbm %s1077_s0, %s613_s7  ;;  %s182_s11 = scalar_lea.vmem [#allocation2], %s598_s6 }
  0x15   : > { %s191_s12 = sshll.u32 %s182_s11, 4  ;;  %p923_p0 = pnand %p639_p13, %p889_p4  ;;  %s919_s12 = int_to_ptr.vmem [resolvable:$true] %s191_s12 }
  0x16   : > { %s928_s14 = scalar_lea.sflag [#allocation3], %s178_s5  ;;  %s701_s21 = scalar_lea.hbm %s917_s10, 1024 }
  0x17   : > { %p702_p2 = scmp.ne.s32.totalorder %s917_s10, %s701_s21  ;;  %p703_p3 = pneg %p923_p0 }
  0x18   : > { %s706_s25 = scalar_lea.hbm %s1077_s0, 2048  ;;  %p707_p4 = scmp.lt.u32.totalorder %s917_s10, %s1077_s0 }
  0x19   : > { %p704_p5 = pnand %p703_p3, %p702_p2  ;;  %p708_p7 = scmp.lt.u32.totalorder %s706_s25, %s701_s21 }
  0x1a   : > { %p710_p13 = scmp.lt.u32.totalorder %s701_s21, %s917_s10 }
  0x1b   : > { %p705_p6 = pneg %p704_p5  ;;  %p709_p10 = por %p708_p7, %p707_p4 }
  0x1d   : > { %p711_p12 = por %p710_p13, %p709_p10 }
  0x1f   : > { %p712_p1 = pnand %p711_p12, %p705_p6 }
  0x21   : > { %715 = shalt.err (!%p712_p1)
}
  0x22   : > { %s716_s5 = scalar_lea.vmem %s919_s12, 1024  ;;  %s815_s7 = smov [#allocation2]  }
  0x23   : > { %p717_p2 = scmp.ne.s32.totalorder %s919_s12, %s716_s5  ;;  %s721_s8 = sshll.u32 %s815_s7, 4  ;;  %s722_s8 = int_to_ptr.vmem [resolvable:$false] %s721_s8 }
  0x24   : > { %s723_s9 = scalar_lea.vmem %s722_s8, 2048  ;;  %p724_p9 = scmp.lt.s32.totalorder %s919_s12, %s722_s8 }
  0x25   : > { %p719_p5 = pnand %p717_p2, %p703_p3  ;;  %p725_p4 = scmp.lt.s32.totalorder %s723_s9, %s716_s5 }
  0x27   : > { %p720_p11 = pneg %p719_p5  ;;  %p726_p7 = por %p725_p4, %p724_p9 }
  0x29   : > { %p727_p10 = pnand %p726_p7, %p720_p11 }
  0x2b   : > { %730 = shalt.err (!%p727_p10)
}
  0x2c   : > { %s816_s11 = smov 256   ;;  %s817_s21 = smov 16  }
  0x2d   : > { %634 = dma.hbm_to_vmem [thread:$0]  (!%p923_p0), %s917_s10, 1024, %s919_s12, %s928_s14, %s816_s11, %s816_s11, %s817_s21  }
  0x2e   : > { %p199_p12 = scmp.lt.s32.totalorder %s813_s20, 3  ;;  %p1088_p1 = scmp.ge.s32.totalorder %s813_s20, 1 }
  0x30   : > { %p200_p3 = pnand %p1088_p1, %p199_p12 }
  0x31   : > { %s960_s22 = sand.u32 (!%p200_p3), 1, %s797_s16  }
  0x32   : > { %203 = sbr.rel (%p200_p3) target bundleno = 440 (0x1b8), region = 36  ;;  %s602_s24 = sshll.u32 (!%p200_p3), %s960_s22, 6 }
  0x33   : > { %s206_s25 = scalar_lea.sflag (!%p200_p3), [#allocation3], %s960_s22  ;;  %s966_s26 = scalar_lea.vmem (!%p200_p3), [#allocation2], %s602_s24 }
  0x39   : > { %784 = dma.done.wait (%p895_p8), %s206_s25, 1024  }
  0x3a   : > { %786 = vsyncadd (%p895_p8), %s206_s25, 4294966272  ;;  %v818_v0 = vmov 0   ;;  %v309_v1 = vld [vmem:[%s1079_s2] sm:$0xff]  ;;  %v310_v3 = vld [vmem:[%s1079_s2 + $0x8] sm:$0xff]  ;;  %v819_v11 = vmov 0.0   ;;  %vm381_vm0 = vcmask 261120  }
  0x3b   : > { %696 = vset.pattern.permute.xlu1 %v818_v0  ;;  %695 = vset.pattern.permute.xlu0 %v818_v0  ;;  %v305_v2 = vld [vmem:[%s1078_s1] sm:$0xff]  ;;  %v306_v4 = vld [vmem:[%s1078_s1 + $0x8] sm:$0xff]  ;;  %v308_v5 = vld [vmem:[%s1078_s1 + $0x18] sm:$0xff]  ;;  %s233_s11 = scalar_lea.vmem [#allocation5], %s602_s24  ;;  %s614_s25 = sshll.u32 %s805_s18, 10 }
  0x3c   : > { %351 = vperm.xlu1 %696, %v309_v1   ;;  %323 = vperm.xlu0 %695, %v305_v2   ;;  %v307_v6 = vld [vmem:[%s1078_s1 + $0x10] sm:$0xff]  ;;  %v312_v7 = vld [vmem:[%s1079_s2 + $0x18] sm:$0xff]  ;;  %v236_v9 = vld [vmem:[%s966_s26] sm:$0xff]  ;;  %s507_s21 = sshll.u32 %s233_s11, 4  ;;  %s1028_s24 = scalar_lea.hbm %s1081_s4, %s614_s25  ;;  %s1023_s21 = int_to_ptr.vmem [resolvable:$true] %s507_s21 }
  0x3d   : > { %v311_v8 = vld [vmem:[%s1079_s2 + $0x10] sm:$0xff]  ;;  %458 = vmatprep.mubr.f32.mxu0 %v819_v11  ;;  %470 = vmatprep.mubr.f32.mxu1 %v819_v11  ;;  %v237_v12 = vld [vmem:[%s966_s26 + $0x8] sm:$0xff]  ;;  %v239_v13 = vld [vmem:[%s966_s26 + $0x18] sm:$0xff]  ;;  %s492_s18 = scalar_lea.sflag [#allocation4], %s960_s22  ;;  %s731_s13 = scalar_lea.vmem %s1023_s21, 1024 }
  0x3e   : > { %v238_v10 = vld [vmem:[%s966_s26 + $0x10] sm:$0xff]  ;;  %v240_v15 = vld [vmem:[%s966_s26 + $0x20] sm:$0xff]  ;;  %v253_v16 = vadd.f32 %v239_v13, %v237_v12  ;;  %v241_v17 = vld [vmem:[%s966_s26 + $0x28] sm:$0xff]  ;;  %p732_p8 = scmp.ne.s32.totalorder %s1023_s21, %s731_s13  ;;  %p1089_p9 = scmp.ne.s32.totalorder %s1085_s28, 0 }
  0x3f   : > { %v244_v14 = vadd.f32 %v238_v10, %v236_v9  ;;  %v242_v19 = vld [vmem:[%s966_s26 + $0x30] sm:$0xff]  ;;  %v243_v21 = vld [vmem:[%s966_s26 + $0x38] sm:$0xff]  ;;  %s820_s26 = smov [#allocation5]  }
  0x40   : > { %356 = vperm.xlu1 %696, %v310_v3   ;;  %328 = vperm.xlu0 %695, %v306_v4   ;;  %v254_v20 = vadd.f32 %v253_v16, %v241_v17  ;;  %p733_p11 = pnand %p732_p8, %p1089_p9  ;;  %s735_s14 = sshll.u32 %s820_s26, 4  ;;  %s736_s14 = int_to_ptr.vmem [resolvable:$false] %s735_s14 }
  0x41   : > { %v245_v18 = vadd.f32 %v244_v14, %v240_v15  ;;  %s737_s6 = scalar_lea.vmem %s736_s14, 2048  ;;  %p738_p6 = scmp.lt.s32.totalorder %s1023_s21, %s736_s14 }
  0x42   : > { %v255_v23 = vadd.f32 %v254_v20, %v243_v21  ;;  %p734_p0 = pneg %p733_p11  ;;  %p739_p13 = scmp.lt.s32.totalorder %s737_s6, %s731_s13 }
  0x43   : > { %v246_v22 = vadd.f32 %v245_v18, %v242_v19 }
  0x44   : > { %338 = vperm.xlu1 %696, %v308_v5   ;;  %333 = vperm.xlu0 %695, %v307_v6   ;;  %v256_v25 = vrot.slane %v255_v23, 4  ;;  %p740_p2 = por %p739_p13, %p738_p6 }
  0x45   : > { %v247_v24 = vrot.slane %v246_v22, 4 }
  0x46   : > { %v257_v27 = vadd.f32 %v256_v25, %v255_v23  ;;  %p741_p5 = pnand %p740_p2, %p734_p0 }
  0x47   : > { %v248_v26 = vadd.f32 %v247_v24, %v246_v22 }
  0x48   : > { %366 = vperm.xlu1 %696, %v312_v7   ;;  %361 = vperm.xlu0 %695, %v311_v8   ;;  %v258_v29 = vrot.slane %v257_v27, 2 }
  0x49   : > { %v249_v28 = vrot.slane %v248_v26, 2 }
  0x4a   : > { %v259_v31 = vadd.f32 %v258_v29, %v257_v27 }
  0x4b   : > { %v250_v30 = vadd.f32 %v249_v28, %v248_v26 }
  0x4c   : > { %v260_v33 = vrot.slane %v259_v31, 1 }
  0x4d   : > { %v251_v32 = vrot.slane %v250_v30, 1 }
  0x4e   : > { %v261_v35 = vadd.f32 %v260_v33, %v259_v31 }
  0x4f   : > { %v252_v34 = vadd.f32 %v251_v32, %v250_v30 }
  0x50   : > { %v264_v37 = vmul.f32 0.03125, %v261_v35 }
  0x51   : > { %v263_v36 = vmul.f32 0.03125, %v252_v34 }
  0x52   : > { %v266_v40 = vsub.f32 %v237_v12, %v264_v37  ;;  %v268_v41 = vsub.f32 %v239_v13, %v264_v37  ;;  %v270_v45 = vsub.f32 %v241_v17, %v264_v37  ;;  %v272_v51 = vsub.f32 %v243_v21, %v264_v37 }
  0x53   : > { %v265_v38 = vsub.f32 %v236_v9, %v263_v36  ;;  %v267_v39 = vsub.f32 %v238_v10, %v263_v36  ;;  %v269_v42 = vsub.f32 %v240_v15, %v263_v36  ;;  %v271_v48 = vsub.f32 %v242_v19, %v263_v36 }
  0x54   : > { %v274_v46 = vmul.f32 %v266_v40, %v266_v40  ;;  %v276_v47 = vmul.f32 %v268_v41, %v268_v41  ;;  %v278_v52 = vmul.f32 %v270_v45, %v270_v45  ;;  %v280_v56 = vmul.f32 %v272_v51, %v272_v51 }
  0x55   : > { %v273_v43 = vmul.f32 %v265_v38, %v265_v38  ;;  %v275_v44 = vmul.f32 %v267_v39, %v267_v39  ;;  %v277_v49 = vmul.f32 %v269_v42, %v269_v42  ;;  %v279_v54 = vmul.f32 %v271_v48, %v271_v48 }
  0x56   : > { %v290_v53 = vadd.f32 %v276_v47, %v274_v46 }
  0x57   : > { %v281_v50 = vadd.f32 %v275_v44, %v273_v43 }
  0x58   : > { %v291_v57 = vadd.f32 %v290_v53, %v278_v52  ;;  %v379_v52 = vld [vmem:[%s1080_s3 + $0x10] sm:$0xff]  ;;  %v378_v53 = vld [vmem:[%s1080_s3 + $0x8] sm:$0xff] }
  0x59   : > { %v282_v55 = vadd.f32 %v281_v50, %v277_v49 }
  0x5a   : > { %v292_v59 = vadd.f32 %v291_v57, %v280_v56 }
  0x5b   : > { %v283_v58 = vadd.f32 %v282_v55, %v279_v54  ;;  %v380_v54 = vld [vmem:[%s1080_s3 + $0x18] sm:$0xff] }
  0x5c   : > { %v293_v61 = vrot.slane %v292_v59, 4 }
  0x5d   : > { %v284_v60 = vrot.slane %v283_v58, 4 }
  0x5e   : > { %v294_v63 = vadd.f32 %v293_v61, %v292_v59 }
  0x5f   : > { %v285_v62 = vadd.f32 %v284_v60, %v283_v58 }
  0x60   : > { %v295_v1 = vrot.slane %v294_v63, 2 }
  0x61   : > { %v286_v0 = vrot.slane %v285_v62, 2 }
  0x62   : > { %v296_v3 = vadd.f32 %v295_v1, %v294_v63 }
  0x63   : > { %v287_v2 = vadd.f32 %v286_v0, %v285_v62 }
  0x64   : > { %v297_v5 = vrot.slane %v296_v3, 1 }
  0x65   : > { %v288_v4 = vrot.slane %v287_v2, 1 }
  0x66   : > { %v298_v7 = vadd.f32 %v297_v5, %v296_v3 }
  0x67   : > { %v289_v6 = vadd.f32 %v288_v4, %v287_v2 }
  0x68   : > { %v300_v9 = vmul.f32 0.03125, %v298_v7 }
  0x69   : > { %v299_v8 = vmul.f32 0.03125, %v289_v6 }
  0x6a   : > { %v302_v12 = vadd.f32 1e-05, %v300_v9 }
  0x6b   : > { %v301_v10 = vadd.f32 1e-05, %v299_v8 }
  0x6d   : > { %697 = vrsqrt.f32 %v301_v10 }
  0x6e   : > { %699 = vrsqrt.f32 %v302_v12 }
  0x77   : > { %v698_v13 = vpop.eup %697 }
  0x78   : > { %v700_v14 = vpop.eup %699  ;;  %v313_v17 = vmul.f32 %v698_v13, %v265_v38  ;;  %v315_v19 = vmul.f32 %v698_v13, %v267_v39  ;;  %v319_v27 = vmul.f32 %v698_v13, %v271_v48  ;;  %v317_v28 = vmul.f32 %v698_v13, %v269_v42 }
  0x79   : > { %v314_v18 = vmul.f32 %v700_v14, %v266_v40  ;;  %v316_v20 = vmul.f32 %v700_v14, %v268_v41  ;;  %v320_v29 = vmul.f32 %v700_v14, %v272_v51  ;;  %v318_v30 = vmul.f32 %v700_v14, %v270_v45  ;;  %v377_v51 = vld [vmem:[%s1080_s3] sm:$0xff] }
  0xbb   : > { %v352_v15 = vpop.permute.xlu1 %351  ;;  %v324_v16 = vpop.permute.xlu0 %323 }
  0xbc   : > { %v341_v21 = vmul.f32 %v324_v16, %v313_v17  ;;  %v342_v22 = vmul.f32 %v324_v16, %v314_v18 }
  0xbe   : > { %v370_v35 = vadd.f32 %v352_v15, %v342_v22  ;;  %v369_v36 = vadd.f32 %v352_v15, %v341_v21 }
  0xbf   : > { %v357_v23 = vpop.permute.xlu1 %356  ;;  %v329_v24 = vpop.permute.xlu0 %328 }
  0xc0   : > { %v343_v25 = vmul.f32 %v329_v24, %v315_v19  ;;  %v344_v26 = vmul.f32 %v329_v24, %v316_v20 }
  0xc2   : > { %v372_v31 = vadd.f32 %v357_v23, %v344_v26  ;;  %v371_v32 = vadd.f32 %v357_v23, %v343_v25 }
  0xc3   : > { %v339_v33 = vpop.permute.xlu1 %338  ;;  %v334_v34 = vpop.permute.xlu0 %333 }
  0xc4   : > { %v615_v37 = vpack.c.bf16 %v372_v31, %v370_v35  ;;  %v617_v38 = vpack.c.bf16 %v371_v32, %v369_v36  ;;  %v347_v39 = vmul.f32 %v339_v33, %v319_v27  ;;  %v348_v40 = vmul.f32 %v339_v33, %v320_v29 }
  0xc5   : > { %v345_v41 = vmul.f32 %v334_v34, %v317_v28  ;;  %v346_v43 = vmul.f32 %v334_v34, %v318_v30 }
  0xc6   : > { %616 = vmatprep.subr.bf16.mxu0 %v615_v37  ;;  %623 = vmatprep.subr.bf16.mxu1 %v615_v37 }
  0xc7   : > { %v367_v44 = vpop.permute.xlu1 %366  ;;  %v362_v46 = vpop.permute.xlu0 %361  ;;  %618 = vmatpush1.bf16.msra.mxu0 %v617_v38  ;;  %625 = vmatpush1.bf16.msra.mxu1 %v617_v38 }
  0xc8   : > { %v375_v47 = vadd.f32 %v367_v44, %v347_v39  ;;  %v376_v42 = vadd.f32 %v367_v44, %v348_v40  ;;  %v373_v48 = vadd.f32 %v362_v46, %v345_v41  ;;  %v374_v45 = vadd.f32 %v362_v46, %v346_v43 }
  0xca   : > { %v619_v49 = vpack.c.bf16 %v376_v42, %v374_v45  ;;  %v621_v50 = vpack.c.bf16 %v375_v47, %v373_v48 }
  0xcc   : > { %620 = vmatprep.subr.bf16.mxu0 %v619_v49  ;;  %624 = vmatprep.subr.bf16.mxu1 %v619_v49 }
  0xcd   : > { %622 = vmatpush1.bf16.msra.mxu0 %v621_v50  ;;  %626 = vmatpush1.bf16.msra.mxu1 %v621_v50 }
  0xd0   : > { %604 = vmatmul.mubr.msk.f32.vlgmr.msra.gmra.mrb[0].mxu0 %vm381_vm0, %v377_v51  ;;  %606 = vmatmul.mubr.msk.f32.vlgmr.msra.gmra.mrb[0].mxu1 %vm381_vm0, %v379_v52 }
  0xd1   : > { %464 = vmatprep.mubr.f32.mxu0 %v819_v11  ;;  %476 = vmatprep.mubr.f32.mxu1 %v819_v11 }
  0xd4   : > { %605 = vmatmul.mubr.msk.f32.gmra.mrb[2].mxu0 %vm381_vm0, %v378_v53  ;;  %607 = vmatmul.mubr.msk.f32.gmra.mrb[2].mxu1 %vm381_vm0, %v380_v54 }
 0x1a3   : > { %v460_v55 = vpop.f32.mrb[0].mxu0  ;;  %v472_v56 = vpop.f32.mrb[0].mxu1 }
 0x1a4   : > { %483 = vst [vmem:[%s233_s11] sm:$0xff] %v460_v55  ;;  %487 = vst [vmem:[%s233_s11 + $0x20] sm:$0xff] %v472_v56  ;;  %v462_v11 = vpop.f32.mrb[1].mxu0  ;;  %v474_v57 = vpop.f32.mrb[1].mxu1 }
 0x1a5   : > { %484 = vst [vmem:[%s233_s11 + $0x8] sm:$0xff] %v462_v11  ;;  %488 = vst [vmem:[%s233_s11 + $0x28] sm:$0xff] %v474_v57 }
 0x1a7   : > { %v466_v58 = vpop.f32.mrb[2].mxu0  ;;  %v478_v59 = vpop.f32.mrb[2].mxu1 }
 0x1a8   : > { %485 = vst [vmem:[%s233_s11 + $0x10] sm:$0xff] %v466_v58  ;;  %489 = vst [vmem:[%s233_s11 + $0x30] sm:$0xff] %v478_v59  ;;  %v468_v60 = vpop.f32.mrb[3].mxu0  ;;  %v480_v61 = vpop.f32.mrb[3].mxu1 }
 0x1a9   : > { %486 = vst [vmem:[%s233_s11 + $0x18] sm:$0xff] %v468_v60  ;;  %490 = vst [vmem:[%s233_s11 + $0x38] sm:$0xff] %v480_v61 }
 0x1aa   : > { %744 = shalt.err (!%p741_p5)
}
 0x1ab   : > { %s745_s5 = scalar_lea.hbm %s1028_s24, 1024  ;;  %s749_s8 = scalar_lea.hbm %s1081_s4, 2048 }
 0x1ac   : > { %p746_p4 = scmp.ne.s32.totalorder %s1028_s24, %s745_s5  ;;  %p750_p12 = scmp.lt.u32.totalorder %s1028_s24, %s1081_s4 }
 0x1ad   : > { %p751_p1 = scmp.lt.u32.totalorder %s749_s8, %s745_s5  ;;  %p753_p8 = scmp.lt.u32.totalorder %s745_s5, %s1028_s24 }
 0x1ae   : > { %p747_p7 = pnand %p746_p4, %p1089_p9 }
 0x1af   : > { %p752_p3 = por %p751_p1, %p750_p12 }
 0x1b0   : > { %p748_p10 = pneg %p747_p7 }
 0x1b1   : > { %p754_p11 = por %p753_p8, %p752_p3 }
 0x1b3   : > { %p755_p0 = pnand %p754_p11, %p748_p10 }
 0x1b5   : > { %758 = shalt.err (!%p755_p0)
}
 0x1b6   : > { %s821_s25 = smov 256   ;;  %s822_s10 = smov 16  }
 0x1b7   : > { %629 = dma.vmem_to_hbm [thread:$0]  (%p1089_p9), %s1023_s21, 1024, %s1028_s24, %s492_s18, %s821_s25, %s821_s25, %s822_s10  }
 0x1b8 PF: > { %s522_s12 = sand.u32 1, %s793_s15   ;;  %p1090_p6 = scmp.ne.s32.totalorder %s1086_s30, 0 }
 0x1b9   : > { %p1091_p13 = scmp.ge.s32.totalorder %s813_s20, 2  ;;  %s523_s13 = scalar_lea.sflag [#allocation4], %s522_s12 }
 0x1bb   : > { %p636_p2 = pnand %p1091_p13, %p1090_p6 }
 0x1bd   : > { %788 = dma.done.wait (!%p636_p2), %s523_s13, 1024  }
 0x1be   : > { %790 = vsyncadd (!%p636_p2), %s523_s13, 4294966272  ;;  %s20_s20 = sadd.s32 1, %s813_s20   ;;  %s1092_s15 = smov %s797_s16 }
 0x1bf   : > { %p17_p5 = scmp.ge.s32.totalorder %s20_s20, 4   ;;  %s1093_s16 = smov %s801_s17 }
 0x1c0   : > { %s1094_s17 = smov %s904_s29  ;;  %s1095_s18 = smov %s809_s19 }
 0x1c1   : > { %s1096_s19 = smov %s1098_s23  ;;  %19 = sbr.rel (!%p17_p5) target bundleno = 6 (0x6), region = 81 }
 0x1c8   :  { %528 = vsyncpa [#allocation3], 1 }
 0x1c9   :  { %530 = vsyncpa [#allocation3 + $0x1], 1 }
 0x1ca   :  { %531 = vsyncpa [#allocation4], 1 }
 0x1cb   :  { %533 = vsyncpa [#allocation4 + $0x1], 1 }

</bundles_post_ra>
